<compile_context>
chip_gen: v7x
topology: tpu7x:2x2x1
jax: 0.10.0
libtpu: 0.0.40
codegen_flags: <defaults>
</compile_context>

<pallas_src>
import jax
import jax.numpy as jnp
from jax.experimental import pallas as pl
from jax.experimental.pallas import tpu as pltpu


def _round_up(x: int, m: int) -> int:
    return (x + m - 1) // m * m


def _pad2d(a, rows: int, cols: int):
    pr, pc = rows - a.shape[0], cols - a.shape[1]
    if pr or pc:
        a = jnp.pad(a, ((0, pr), (0, pc)))
    return a


def _vmem_capacity_bytes() -> int:
    try:
        return int(pltpu.get_tpu_info().vmem_capacity_bytes)
    except Exception:
        # Conservative fallback = v7x per-TensorCore VMEM (smallest current gen).
        return 64 * 1024 * 1024


def _buffers_bytes(tm: int, tn: int, tk: int, dim_p: int) -> int:
    # All pipeline buffers, assuming default double-buffering everywhere.
    return (2 * tm * dim_p * 4      # x tile        (f32)
            + 2 * dim_p * tk * 2    # w1.T slice    (bf16)
            + 2 * tk * tn * 2       # w2.T slice    (bf16)
            + 2 * tm * tn * 4)      # out / accum   (f32)


def _choose_tiles(M: int, dim_p: int, hid_p: int, out_p: int, vmem_budget: int):
    """Pick (tm, tn, tk) that exactly divide the padded dims and fit the budget."""
    m_need = _round_up(max(M, 8), 8)
    tm_cands = sorted({min(t, m_need) for t in (512, 384, 256, 192, 128, 64, 32, 16, 8)},
                      reverse=True)

    # Pass 1: full weight residency (grid_k == grid_n == 1).  The weight block
    # indices never change, so both matrices are DMA'd once for the whole grid.
    for tm in tm_cands:
        if tm < min(m_need, 256):
            break
        if _buffers_bytes(tm, out_p, hid_p, dim_p) <= vmem_budget:
            return tm, out_p, hid_p

    # Pass 2: big batch tile first, then split hidden and/or output dims.
    tk_cands = [hid_p] + [t for t in (2048, 1024, 512, 256, 128)
                          if t < hid_p and hid_p % t == 0]
    tn_cands = [out_p] + [t for t in (4096, 2048, 1024, 512, 256, 128)
                          if t < out_p and out_p % t == 0]
    for tm in tm_cands:
        for tk in tk_cands:
            for tn in tn_cands:
                if _buffers_bytes(tm, tn, tk, dim_p) <= vmem_budget:
                    return tm, tn, tk

    # Last resort: smallest legal tiles (only reachable for absurd dim sizes).
    return 8, min(out_p, 128), min(hid_p, 128)


def mlp_kernel(x_ref, w1t_ref, w2t_ref, o_ref):
    # x_ref:   (tm, dim_p) f32  batch tile (cast to bf16 per tile, no pre-pass)
    # w1t_ref: (dim_p, tk) bf16 hidden-slice of w1.T
    # w2t_ref: (tk, tn)    bf16 (hidden, out)-slice of w2.T
    # o_ref:   (tm, tn)    f32  output tile; VMEM-resident across the k axis,
    #                           it doubles as the accumulator (no scratch).
    k = pl.program_id(2)

    xb = x_ref[...].astype(jnp.bfloat16)
    h = jnp.dot(xb, w1t_ref[...], preferred_element_type=jnp.float32)
    contrib = jnp.dot(h.astype(jnp.bfloat16), w2t_ref[...],
                      preferred_element_type=jnp.float32)

    @pl.when(k == 0)
    def _init():
        o_ref[...] = contrib

    @pl.when(k > 0)
    def _accum():
        o_ref[...] += contrib

    @pl.when(k == pl.num_programs(2) - 1)
    def _finalize():
        o_ref[...] = jnp.maximum(o_ref[...], 0.0)


def prepare_mlp_params(w1, w2):
    """One-time weight prep (transpose + pad + bf16 cast), hoisted out of the call path.

    w1: [hidden_dim, dim]   (torch nn.Linear layout)
    w2: [out_dim, hidden_dim]
    """
    hidden_dim, dim = w1.shape
    out_dim, hidden_dim2 = w2.shape
    assert hidden_dim2 == hidden_dim
    dim_p = _round_up(dim, 128)
    # Multiple of 256 (unless tiny) so any hidden split uses full 256x256 MXU
    # passes and always has a tk=256 divisor (no tk=128 perf cliff).
    hid_p = _round_up(hidden_dim, 128 if hidden_dim <= 128 else 256)
    out_p = _round_up(out_dim, 128)
    w1t = _pad2d(w1.T, dim_p, hid_p).astype(jnp.bfloat16)  # (dim_p, hid_p)
    w2t = _pad2d(w2.T, hid_p, out_p).astype(jnp.bfloat16)  # (hid_p, out_p)
    return {"w1t": w1t, "w2t": w2t, "dim": dim, "out_dim": out_dim}


def mlp_forward(x, params):
    """x: [M, dim]; returns relu((x @ w1.T) @ w2.T) as [M, out_dim] in x.dtype."""
    w1t, w2t = params["w1t"], params["w2t"]
    dim, out_dim = params["dim"], params["out_dim"]

    M = x.shape[0]
    assert x.shape[1] == dim
    dim_p, hid_p = w1t.shape
    out_p = w2t.shape[1]

    vmem_cap = _vmem_capacity_bytes()
    vmem_budget = int(vmem_cap * 0.75)           # headroom for Mosaic internal scratch

    tm, tn, tk = _choose_tiles(M, dim_p, hid_p, out_p, vmem_budget)

    # v7x megacore: when everything lands in a single (i, j) block, split the
    # batch tile so both TensorCores get a "parallel" block (no-op on v5e/v6e).
    if pl.cdiv(M, tm) == 1 and out_p // tn == 1 and tm >= 256:
        tm = _round_up(tm // 2, 8)

    m_pad = _round_up(max(M, 8), tm)
    grid_m = m_pad // tm
    grid_n = out_p // tn
    grid_k = hid_p // tk

    # Per-call prep: zero-pad only (no dtype pre-pass; the kernel casts each
    # tile to bf16).  No-op when M and dim are already aligned.
    x_p = _pad2d(x.astype(jnp.float32), m_pad, dim_p)

    est = _buffers_bytes(tm, tn, tk, dim_p)
    vmem_limit = int(min(vmem_cap, max(est + (8 << 20), 32 << 20)))

    out_padded = pl.pallas_call(
        mlp_kernel,
        out_shape=jax.ShapeDtypeStruct((m_pad, out_p), jnp.float32),
        grid_spec=pltpu.PrefetchScalarGridSpec(
            num_scalar_prefetch=0,
            grid=(grid_m, grid_n, grid_k),
            in_specs=[
                pl.BlockSpec((tm, dim_p), lambda i, j, k: (i, 0)),
                pl.BlockSpec((dim_p, tk), lambda i, j, k: (0, k)),
                pl.BlockSpec((tk, tn), lambda i, j, k: (k, j)),
            ],
            out_specs=pl.BlockSpec((tm, tn), lambda i, j, k: (i, j)),
        ),
        compiler_params=pltpu.CompilerParams(
            dimension_semantics=("parallel", "parallel", "arbitrary"),
            vmem_limit_bytes=vmem_limit,
        ),
    )(x_p, w1t, w2t)

    return out_padded[:M, :out_dim].astype(x.dtype)


def mlp_reference(x, w1, w2):
    # f32 reference of the original torch module.
    return jnp.maximum((x @ w1.T) @ w2.T, 0.0)


def mlp_reference_bf16(x, w1, w2):
    # Emulates the kernel's numerics (bf16 operands, f32 MXU accumulation).
    xb = x.astype(jnp.bfloat16)
    h = jnp.dot(xb, w1.T.astype(jnp.bfloat16), preferred_element_type=jnp.float32)
    y = jnp.dot(h.astype(jnp.bfloat16), w2.T.astype(jnp.bfloat16),
                preferred_element_type=jnp.float32)
    return jnp.maximum(y, 0.0)


def _run_case(key, batch, dim, hidden_dim, out_dim):
    kx, k1, k2 = jax.random.split(key, 3)
    x = jax.random.normal(kx, (batch, dim), dtype=jnp.float32)
    bound1 = 1.0 / (dim ** 0.5)
    bound2 = 1.0 / (hidden_dim ** 0.5)
    w1 = jax.random.uniform(k1, (hidden_dim, dim), jnp.float32, -bound1, bound1)
    w2 = jax.random.uniform(k2, (out_dim, hidden_dim), jnp.float32, -bound2, bound2)

    params = prepare_mlp_params(w1, w2)   # one-time: transpose + pad + bf16 cast
    out = jax.block_until_ready(mlp_forward(x, params))

    assert out.shape == (batch, out_dim)
    ref_bf16 = mlp_reference_bf16(x, w1, w2)
    ref_f32 = mlp_reference(x, w1, w2)
    assert jnp.allclose(out, ref_bf16, atol=5e-3, rtol=5e-3), (
        float(jnp.max(jnp.abs(out - ref_bf16))))
    assert jnp.allclose(out, ref_f32, atol=5e-2, rtol=5e-2), (
        float(jnp.max(jnp.abs(out - ref_f32))))


if __name__ == "__main__":
    key = jax.random.PRNGKey(0)
    k_a, k_b = jax.random.split(key)

    # Case 1: small, deliberately non-aligned shapes (exercises all padding paths).
    _run_case(k_a, batch=10, dim=48, hidden_dim=96, out_dim=40)
    # Case 2: larger batch (exercises multi-tile batch / megacore split path).
    _run_case(k_b, batch=272, dim=128, hidden_dim=256, out_dim=128)

    print("KERNEL_OK")
</pallas_src>

<mosaic_0001>
module attributes {stable_mosaic.version = 11 : i64} {
  func.func @mlp_kernel(%arg0: i32, %arg1: i32, %arg2: i32, %arg3: memref<16x128xf32, #tpu.memory_space<vmem>>, %arg4: memref<128x128xbf16, #tpu.memory_space<vmem>>, %arg5: memref<128x128xbf16, #tpu.memory_space<vmem>>, %arg6: memref<16x128xf32, #tpu.memory_space<vmem>>) attributes {dimension_semantics = [#tpu.dimension_semantics<parallel>, #tpu.dimension_semantics<parallel>, #tpu.dimension_semantics<arbitrary>], iteration_bounds = array<i64: 1, 1, 1>, scalar_prefetch = 0 : i64, scratch_operands = 0 : i64, tpu.core_type = #tpu.core_type<tc>, window_params = [{transform_indices = @transform_0, window_bounds = array<i64: 16, 128>}, {transform_indices = @transform_1, window_bounds = array<i64: 128, 128>}, {transform_indices = @transform_2, window_bounds = array<i64: 128, 128>}, {transform_indices = @transform_3, window_bounds = array<i64: 16, 128>}]} {
    %c0 = arith.constant 0 : index
    %c0_0 = arith.constant 0 : index
    %0 = vector.load %arg3[%c0, %c0_0] : memref<16x128xf32, #tpu.memory_space<vmem>>, vector<16x128xf32>
    %1 = arith.truncf %0 : vector<16x128xf32> to vector<16x128xbf16>
    %c0_1 = arith.constant 0 : index
    %c0_2 = arith.constant 0 : index
    %2 = vector.load %arg4[%c0_1, %c0_2] : memref<128x128xbf16, #tpu.memory_space<vmem>>, vector<128x128xbf16>
    %cst = arith.constant dense<0.000000e+00> : vector<16x128xf32>
    %3 = tpu.matmul %1, %2, %cst {dimension_numbers = #tpu.dot_dimension_numbers<[1], [0], [0], [1], [0, 0, 1, 1], [], []>} : vector<16x128xbf16>, vector<128x128xbf16>, vector<16x128xf32> -> vector<16x128xf32>
    %4 = arith.truncf %3 : vector<16x128xf32> to vector<16x128xbf16>
    %c0_3 = arith.constant 0 : index
    %c0_4 = arith.constant 0 : index
    %5 = vector.load %arg5[%c0_3, %c0_4] : memref<128x128xbf16, #tpu.memory_space<vmem>>, vector<128x128xbf16>
    %cst_5 = arith.constant dense<0.000000e+00> : vector<16x128xf32>
    %6 = tpu.matmul %4, %5, %cst_5 {dimension_numbers = #tpu.dot_dimension_numbers<[1], [0], [0], [1], [0, 0, 1, 1], [], []>} : vector<16x128xbf16>, vector<128x128xbf16>, vector<16x128xf32> -> vector<16x128xf32>
    %c0_i32 = arith.constant 0 : i32
    %7 = arith.cmpi eq, %arg2, %c0_i32 : i32
    %8 = arith.extui %7 : i1 to i32
    %c0_i32_6 = arith.constant 0 : i32
    %9 = arith.cmpi ne, %8, %c0_i32_6 : i32
    scf.if %9 {
      %c0_11 = arith.constant 0 : index
      %c0_12 = arith.constant 0 : index
      %16 = vector.load %arg6[%c0_11, %c0_12] : memref<16x128xf32, #tpu.memory_space<vmem>>, vector<16x128xf32>
      tpu.vector_store %arg6[%c0_11, %c0_12], %6 {strides = array<i32>} : memref<16x128xf32, #tpu.memory_space<vmem>>, vector<16x128xf32>,
    } else {
    }
    %c0_i32_7 = arith.constant 0 : i32
    %10 = arith.cmpi sgt, %arg2, %c0_i32_7 : i32
    %11 = arith.extui %10 : i1 to i32
    %c0_i32_8 = arith.constant 0 : i32
    %12 = arith.cmpi ne, %11, %c0_i32_8 : i32
    scf.if %12 {
      %c0_11 = arith.constant 0 : index
      %c0_12 = arith.constant 0 : index
      %16 = vector.load %arg6[%c0_11, %c0_12] : memref<16x128xf32, #tpu.memory_space<vmem>>, vector<16x128xf32>
      %17 = arith.addf %16, %6 : vector<16x128xf32>
      %c0_13 = arith.constant 0 : index
      %c0_14 = arith.constant 0 : index
      %18 = vector.load %arg6[%c0_13, %c0_14] : memref<16x128xf32, #tpu.memory_space<vmem>>, vector<16x128xf32>
      tpu.vector_store %arg6[%c0_13, %c0_14], %17 {strides = array<i32>} : memref<16x128xf32, #tpu.memory_space<vmem>>, vector<16x128xf32>,
    } else {
    }
    %c0_i32_9 = arith.constant 0 : i32
    %13 = arith.cmpi eq, %arg2, %c0_i32_9 : i32
    %14 = arith.extui %13 : i1 to i32
    %c0_i32_10 = arith.constant 0 : i32
    %15 = arith.cmpi ne, %14, %c0_i32_10 : i32
    scf.if %15 {
      %c0_11 = arith.constant 0 : index
      %c0_12 = arith.constant 0 : index
      %16 = vector.load %arg6[%c0_11, %c0_12] : memref<16x128xf32, #tpu.memory_space<vmem>>, vector<16x128xf32>
      %cst_13 = arith.constant 0.000000e+00 : f32
      %17 = vector.broadcast %cst_13 : f32 to vector<16x128xf32>
      %18 = arith.maximumf %16, %17 : vector<16x128xf32>
      %c0_14 = arith.constant 0 : index
      %c0_15 = arith.constant 0 : index
      %19 = vector.load %arg6[%c0_14, %c0_15] : memref<16x128xf32, #tpu.memory_space<vmem>>, vector<16x128xf32>
      tpu.vector_store %arg6[%c0_14, %c0_15], %18 {strides = array<i32>} : memref<16x128xf32, #tpu.memory_space<vmem>>, vector<16x128xf32>,
    } else {
    }
    return
  }
  func.func @transform_0(%arg0: i32, %arg1: i32, %arg2: i32) -> (i32, i32) {
    %c0_i32 = arith.constant 0 : i32
    %c0_i32_0 = arith.constant 0 : i32
    return %arg0, %c0_i32 : i32, i32
  }
  func.func @transform_1(%arg0: i32, %arg1: i32, %arg2: i32) -> (i32, i32) {
    %c0_i32 = arith.constant 0 : i32
    %c0_i32_0 = arith.constant 0 : i32
    return %c0_i32, %arg2 : i32, i32
  }
  func.func @transform_2(%arg0: i32, %arg1: i32, %arg2: i32) -> (i32, i32) {
    %c0_i32 = arith.constant 0 : i32
    return %arg2, %arg1 : i32, i32
  }
  func.func @transform_3(%arg0: i32, %arg1: i32, %arg2: i32) -> (i32, i32) {
    %c0_i32 = arith.constant 0 : i32
    return %arg0, %arg1 : i32, i32
  }
}

</mosaic_0001>

<bundles_post_ra>
// kernel: tpu_custom_call.1
= control target key start
LH: loop header
LB: loop body
LE: loop exit
PB: predicated region body
PF: predicated region fallthrough
CT: control target
= control target key end

     0   :  { %8 = vsyncpa [#allocation3], 0  ;;  %s598_s0 = inlined_call_operand.hbm [shape: f32[16,128], index: 0, kind: input, shape index: {}]   ;;  %s599_s1 = inlined_call_operand.hbm [shape: bf16[128,128], index: 1, kind: input, shape index: {}]   ;;  %s600_s2 = inlined_call_operand.hbm [shape: bf16[128,128], index: 2, kind: input, shape index: {}]   ;;  %s601_s3 = inlined_call_operand.hbm [shape: f32[16,128], index: 3, kind: output, shape index: {}]  }
   0x1   :  { %9 = vsyncpa [#allocation6], 0 }
   0x2   :  { %10 = vsyncpa [#allocation4], 0  ;;  %s508_s12 = smov [#allocation5]   ;;  %s414_s16 = scalar_lea.hbm %s599_s1, 1024 }
   0x3   :  { %s28_s13 = sshll.u32 %s508_s12, 4  ;;  %p415_p0 = scmp.ne.s32.totalorder %s599_s1, %s414_s16  ;;  %s29_s13 = int_to_ptr.vmem [resolvable:$true] %s28_s13 }
   0x4   :  { %p418_p1 = scmp.lt.u32.totalorder %s414_s16, %s599_s1 }
   0x6   :  { %p420_p2 = pnand %p418_p1, %p415_p0 }
   0x8   :  { %423 = shalt.err (!%p420_p2)
}
   0x9   :  { %s424_s21 = scalar_lea.vmem %s29_s13, 1024  ;;  %p429_p4 = scmp.lt.s32.totalorder %s29_s13, %s29_s13 }
   0xa   :  { %p425_p3 = scmp.ne.s32.totalorder %s29_s13, %s424_s21  ;;  %p430_p5 = scmp.lt.s32.totalorder %s424_s21, %s424_s21 }
   0xc   :  { %p431_p6 = por %p430_p5, %p429_p4 }
   0xe   :  { %p432_p7 = pnand %p431_p6, %p425_p3 }
  0x10   :  { %435 = shalt.err (!%p432_p7)
}
  0x11   :  { %s509_s22 = smov 64   ;;  %s510_s23 = smov 4  }
  0x12   :  { %34 = dma.hbm_to_vmem [thread:$0]  %s599_s1, 1024, %s29_s13, [#allocation6], %s509_s22, %s509_s22, %s510_s23  }
  0x13   :  { %s511_s26 = smov [#allocation2]   ;;  %s436_s30 = scalar_lea.hbm %s598_s0, 256 }
  0x14   :  { %s16_s27 = sshll.u32 %s511_s26, 4  ;;  %p437_p8 = scmp.ne.s32.totalorder %s598_s0, %s436_s30  ;;  %s17_s27 = int_to_ptr.vmem [resolvable:$true] %s16_s27 }
  0x15   :  { %p440_p9 = scmp.lt.u32.totalorder %s436_s30, %s598_s0 }
  0x17   :  { %p442_p10 = pnand %p440_p9, %p437_p8 }
  0x19   :  { %445 = shalt.err (!%p442_p10)
}
  0x1a   :  { %s446_s8 = scalar_lea.vmem %s17_s27, 256  ;;  %p451_p12 = scmp.lt.s32.totalorder %s17_s27, %s17_s27 }
  0x1b   :  { %p447_p11 = scmp.ne.s32.totalorder %s17_s27, %s446_s8  ;;  %p452_p13 = scmp.lt.s32.totalorder %s446_s8, %s446_s8 }
  0x1d   :  { %p453_p0 = por %p452_p13, %p451_p12 }
  0x1f   :  { %p454_p1 = pnand %p453_p0, %p447_p11 }
  0x21   :  { %457 = shalt.err (!%p454_p1)
}
  0x22   :  { %s512_s1 = smov 128   ;;  %s513_s9 = smov 8  }
  0x23   :  { %22 = dma.hbm_to_vmem [thread:$0]  %s598_s0, 256, %s17_s27, [#allocation3], %s512_s1, %s512_s1, %s513_s9  }
  0x24   :  { %s514_s12 = smov [#allocation7]   ;;  %s458_s16 = scalar_lea.hbm %s600_s2, 1024 }
  0x25   :  { %s40_s13 = sshll.u32 %s514_s12, 4  ;;  %p459_p2 = scmp.ne.s32.totalorder %s600_s2, %s458_s16  ;;  %s41_s13 = int_to_ptr.vmem [resolvable:$true] %s40_s13 }
  0x26   :  { %p462_p3 = scmp.lt.u32.totalorder %s458_s16, %s600_s2 }
  0x28   :  { %p464_p4 = pnand %p462_p3, %p459_p2 }
  0x2a   :  { %467 = shalt.err (!%p464_p4)
}
  0x2b   :  { %s468_s21 = scalar_lea.vmem %s41_s13, 1024  ;;  %p473_p6 = scmp.lt.s32.totalorder %s41_s13, %s41_s13 }
  0x2c   :  { %p469_p5 = scmp.ne.s32.totalorder %s41_s13, %s468_s21  ;;  %p474_p7 = scmp.lt.s32.totalorder %s468_s21, %s468_s21 }
  0x2e   :  { %p475_p8 = por %p474_p7, %p473_p6 }
  0x30   :  { %p476_p9 = pnand %p475_p8, %p469_p5 }
  0x32   :  { %479 = shalt.err (!%p476_p9)
}
  0x33   :  { %46 = dma.hbm_to_vmem [thread:$0]  %s600_s2, 1024, %s41_s13, [#allocation6], %s509_s22, %s509_s22, %s510_s23  }
  0x34   :  { %502 = dma.done.wait [#allocation3], 256  }
  0x35   :  { %503 = vsyncadd [#allocation3], 4294967040 }
  0x36   :  { %504 = dma.done.wait [#allocation6], 2048  }
  0x37   :  { %505 = vsyncadd [#allocation6], 4294965248  ;;  %v515_v0 = vmov 0.0   ;;  %vm516_vm0 = vmmov 0   ;;  %v398_v1 = vld [vmem:[#allocation5] sm:$0xff]   ;;  %v399_v2 = vld [vmem:[#allocation5 + $0x8] sm:$0xff]  }
  0x38   :  { %348 = vmatprep.subr.bf16.mxu0 %v515_v0  ;;  %364 = vmatprep.mubr.msk.bf16.mxu0 %vm516_vm0, %v515_v0  ;;  %v400_v3 = vld [vmem:[#allocation5 + $0x10] sm:$0xff]   ;;  %v406_v4 = vld [vmem:[#allocation7] sm:$0xff]   ;;  %v401_v5 = vld [vmem:[#allocation5 + $0x18] sm:$0xff]   ;;  %s517_s2 = smov [#allocation8]  }
  0x39   :  { %368 = vmatprep.subr.bf16.mxu1 %v515_v0  ;;  %384 = vmatprep.mubr.msk.bf16.mxu1 %vm516_vm0, %v515_v0  ;;  %v407_v6 = vld [vmem:[#allocation7 + $0x8] sm:$0xff]   ;;  %v402_v7 = vld [vmem:[#allocation5 + $0x20] sm:$0xff]   ;;  %v408_v8 = vld [vmem:[#allocation7 + $0x10] sm:$0xff]   ;;  %s301_s22 = sshll.u32 %s517_s2, 4  ;;  %s302_s22 = int_to_ptr.vmem [resolvable:$true] %s301_s22 }
  0x3a   :  { %349 = vmatpush3.bf16.msra.mxu0 %v398_v1  ;;  %369 = vmatpush3.bf16.msra.mxu1 %v406_v4  ;;  %v403_v9 = vld [vmem:[#allocation5 + $0x28] sm:$0xff]   ;;  %v409_v10 = vld [vmem:[#allocation7 + $0x18] sm:$0xff]   ;;  %v404_v11 = vld [vmem:[#allocation5 + $0x30] sm:$0xff]   ;;  %s480_s23 = scalar_lea.vmem %s302_s22, 256  ;;  %p485_p11 = scmp.lt.s32.totalorder %s302_s22, %s302_s22 }
  0x3b   :  { %350 = vmatprep.subr.bf16.mxu0 %v515_v0  ;;  %370 = vmatprep.subr.bf16.mxu1 %v515_v0  ;;  %v410_v12 = vld [vmem:[#allocation7 + $0x20] sm:$0xff]   ;;  %v405_v13 = vld [vmem:[#allocation5 + $0x38] sm:$0xff]   ;;  %v57_v14 = vld [vmem:[#allocation2] sm:$0xff]  ;;  %p481_p10 = scmp.ne.s32.totalorder %s302_s22, %s480_s23  ;;  %p486_p12 = scmp.lt.s32.totalorder %s480_s23, %s480_s23 }
  0x3c   :  { %v58_v15 = vld [vmem:[#allocation2 + $0x8] sm:$0xff]  ;;  %v411_v16 = vld [vmem:[#allocation7 + $0x28] sm:$0xff]   ;;  %v412_v18 = vld [vmem:[#allocation7 + $0x30] sm:$0xff]  }
  0x3d   :  { %v59_v17 = vpack.c.bf16 %v58_v15, %v57_v14  ;;  %v413_v19 = vld [vmem:[#allocation7 + $0x38] sm:$0xff]   ;;  %p487_p13 = por %p486_p12, %p485_p11 }
  0x3e   :  { %351 = vmatpush3.bf16.msra.mxu0 %v399_v2  ;;  %371 = vmatpush3.bf16.msra.mxu1 %v407_v6 }
  0x3f   :  { %352 = vmatprep.subr.bf16.mxu0 %v515_v0  ;;  %372 = vmatprep.subr.bf16.mxu1 %v515_v0  ;;  %p488_p0 = pnand %p487_p13, %p481_p10 }
  0x42   :  { %353 = vmatpush3.bf16.msra.mxu0 %v400_v3  ;;  %373 = vmatpush3.bf16.msra.mxu1 %v408_v8 }
  0x43   :  { %354 = vmatprep.subr.bf16.mxu0 %v515_v0  ;;  %374 = vmatprep.subr.bf16.mxu1 %v515_v0 }
  0x46   :  { %355 = vmatpush3.bf16.msra.mxu0 %v401_v5  ;;  %375 = vmatpush3.bf16.msra.mxu1 %v409_v10 }
  0x47   :  { %356 = vmatprep.subr.bf16.mxu0 %v515_v0  ;;  %376 = vmatprep.subr.bf16.mxu1 %v515_v0 }
  0x4a   :  { %357 = vmatpush3.bf16.msra.mxu0 %v402_v7  ;;  %377 = vmatpush3.bf16.msra.mxu1 %v410_v12 }
  0x4b   :  { %358 = vmatprep.subr.bf16.mxu0 %v515_v0  ;;  %378 = vmatprep.subr.bf16.mxu1 %v515_v0 }
  0x4e   :  { %359 = vmatpush3.bf16.msra.mxu0 %v403_v9  ;;  %379 = vmatpush3.bf16.msra.mxu1 %v411_v16 }
  0x4f   :  { %360 = vmatprep.subr.bf16.mxu0 %v515_v0  ;;  %380 = vmatprep.subr.bf16.mxu1 %v515_v0 }
  0x52   :  { %361 = vmatpush3.bf16.msra.mxu0 %v404_v11  ;;  %381 = vmatpush3.bf16.msra.mxu1 %v412_v18 }
  0x53   :  { %362 = vmatprep.subr.bf16.mxu0 %v515_v0  ;;  %382 = vmatprep.subr.bf16.mxu1 %v515_v0 }
  0x56   :  { %363 = vmatpush3.bf16.msra.mxu0 %v405_v13  ;;  %383 = vmatpush3.bf16.msra.mxu1 %v413_v19 }
  0x59   :  { %365 = vmatmul.mubr.bf16.vlgmr.msra.gmra.mrb[0].mxu0 %v59_v17 }
 0x12c   :  { %v158_v20 = vpop.f32.mrb[0].mxu0 }
 0x12d   :  { %v366_v21 = vpop.f32.mrb[1].mxu0 }
 0x12e   :  { %v161_v22 = vpop.f32.mrb[2].mxu0 }
 0x12f   :  { %v165_v23 = vpack.c.bf16 %v161_v22, %v158_v20  ;;  %v367_v24 = vpop.f32.mrb[3].mxu0 }
 0x131   :  { %385 = vmatmul.mubr.bf16.vlgmr.msra.gmra.mrb[0].mxu1 %v165_v23 }
 0x204   :  { %v264_v25 = vpop.f32.mrb[0].mxu1 }
 0x205   :  { %v386_v26 = vpop.f32.mrb[1].mxu1  ;;  %v292_v27 = vmax.f32 %v264_v25, 0.0 }
 0x206   :  { %v267_v28 = vpop.f32.mrb[2].mxu1 }
 0x207   :  { %v387_v29 = vpop.f32.mrb[3].mxu1  ;;  %v293_v30 = vmax.f32 %v267_v28, 0.0  ;;  %294 = vst [vmem:[#allocation8] sm:$0xff] %v292_v27 }
 0x209   :  { %295 = vst [vmem:[#allocation8 + $0x8] sm:$0xff] %v293_v30 }
 0x20a   :  { %491 = shalt.err (!%p488_p0)
}
 0x20b   :  { %s492_s27 = scalar_lea.hbm %s601_s3, 256 }
 0x20c   :  { %p493_p1 = scmp.ne.s32.totalorder %s601_s3, %s492_s27  ;;  %p496_p2 = scmp.lt.u32.totalorder %s492_s27, %s601_s3 }
 0x20e   :  { %p498_p3 = pnand %p496_p2, %p493_p1 }
 0x210   :  { %501 = shalt.err (!%p498_p3)
}
 0x211   :  { %307 = dma.vmem_to_hbm [thread:$0]  %s302_s22, 256, %s601_s3, [#allocation4], %s512_s1, %s512_s1, %s513_s9  }
 0x212   :  { %506 = dma.done.wait [#allocation4], 256  }
 0x213   :  { %507 = vsyncadd [#allocation4], 4294967040 }
 0x214   :  { %311 = vsyncpa [#allocation3], 1 }
 0x215   :  { %312 = vsyncpa [#allocation6], 1 }
 0x216   :  { %313 = vsyncpa [#allocation4], 1 }

</bundles_post_ra>
